<compile_context>
chip_gen: v5e
topology: v5e:2x2
jax: 0.10.0
libtpu: 0.0.40
codegen_flags: <defaults>
</compile_context>

<pallas_src>
import functools

import jax
import jax.numpy as jnp
from jax.experimental import pallas as pl
from jax.experimental.pallas import tpu as pltpu


def _pit_loss_kernel(y1_ref, y2_ref, pred_ref, out_ref, *, batch, tile_b, emb,
                     flat_pred):
    pid = pl.program_id(0)

    # Load tiles in their storage dtype, promote to f32 for the accumulation.
    y1 = y1_ref[...].astype(jnp.float32)            # (tile_b, E)
    y2 = y2_ref[...].astype(jnp.float32)            # (tile_b, E)

    if flat_pred:
        # (tile_b, 2*E) lane-dense block; 128-aligned static lane slices are
        # free views (no relayout).
        p = pred_ref[...].astype(jnp.float32)
        p0 = p[:, :emb]
        p1 = p[:, emb:]
    else:
        # Fallback for emb % 128 != 0: (tile_b, 2, E) block (sublane-padded).
        p = pred_ref[...].astype(jnp.float32)
        p0 = p[:, 0, :]
        p1 = p[:, 1, :]

    inv_emb = jnp.float32(1.0 / emb)

    # VALU adds first, then only two cross-lane (XLU) reductions per tile.
    d_id0 = p0 - y1
    d_id1 = p1 - y2
    d_sw0 = p0 - y2
    d_sw1 = p1 - y1
    sq_id = d_id0 * d_id0 + d_id1 * d_id1            # identity assignment
    sq_sw = d_sw0 * d_sw0 + d_sw1 * d_sw1            # swapped assignment
    l_id = jnp.sum(sq_id, axis=-1, keepdims=True) * inv_emb   # (tile_b, 1)
    l_sw = jnp.sum(sq_sw, axis=-1, keepdims=True) * inv_emb   # (tile_b, 1)

    # PyTorch "if l1 > l2: take l2 else take l1" == elementwise minimum.
    per_row = jnp.minimum(l_id, l_sw)                          # (tile_b, 1)

    # Mask padded rows of a ragged last tile (select -> NaN/Inf can't leak).
    row = jax.lax.broadcasted_iota(jnp.int32, (tile_b, 1), 0) + pid * tile_b
    per_row = jnp.where(row < batch, per_row, jnp.float32(0.0))

    # Per-tile partial sum, written into this tile's private (8,128) output
    # block (scalar at [0,0], zeros elsewhere) -> one unmasked lane-dense store
    # per grid step, no serial accumulator, megacore-friendly.
    part = jnp.sum(per_row)
    r = jax.lax.broadcasted_iota(jnp.int32, (8, 128), 0)
    c = jax.lax.broadcasted_iota(jnp.int32, (8, 128), 1)
    out_ref[...] = jnp.where((r == 0) & (c == 0), part, jnp.float32(0.0))


def _vmem_limit_bytes():
    """Per-chip scoped-VMEM limit: ~3/4 of physical, capped at 96 MiB."""
    try:
        cap = pltpu.get_tpu_info().vmem_capacity_bytes
    except Exception:
        cap = 64 << 20  # conservative (v7x per-TC size) if the query fails
    return int(min(cap * 3 // 4, 96 << 20))


def _choose_tile_b(batch, emb, itemsize, flat_pred, vmem_limit):
    """Biggest batch tile whose double-buffered DMAs + f32 temporaries fit."""
    # pred block per row: 2*emb (flattened, lane-dense) or 8*emb (the (2,emb)
    # block's size-2 sublane dim pads to 8).
    pred_cols = 2 * emb if flat_pred else 8 * emb
    in_bytes_per_row = 2 * (emb + emb + pred_cols) * itemsize  # x2 pipeline bufs
    tmp_bytes_per_row = 6 * emb * 4                            # f32 temporaries
    bytes_per_row = in_bytes_per_row + tmp_bytes_per_row
    budget = (vmem_limit * 3) // 4                             # headroom
    cap = (budget // bytes_per_row) // 8 * 8
    cap = int(max(8, cap))
    if batch <= cap:
        return batch          # single / last tile; full-dim block is layout-legal
    return cap                # multiple of 8; ragged last tile is masked in-kernel


def pit_loss(y1, y2, pred, reduction="mean", tile_b=None):
    """Permutation-invariant MSE loss (2 speakers).

    y1, y2: (B, E) float arrays (f32 or bf16 — kept narrow in HBM/VMEM).
    pred:   (B, 2, E) float array.
    Returns a shape-(1,) float32 array (matching the torch.zeros(1) accumulator).
    """
    b, emb = y1.shape
    assert pred.shape == (b, 2, emb), (pred.shape, (b, 2, emb))

    flat_pred = (emb % 128 == 0)
    itemsize = max(jnp.dtype(y1.dtype).itemsize, jnp.dtype(pred.dtype).itemsize)
    vmem_limit = _vmem_limit_bytes()

    if tile_b is None:
        tile_b = _choose_tile_b(b, emb, itemsize, flat_pred, vmem_limit)
    if tile_b >= b:
        tile_b = b
    else:
        assert tile_b % 8 == 0, "batch tile must be a multiple of 8 when gridding"

    n_tiles = pl.cdiv(b, tile_b)

    if flat_pred:
        pred_in = pred.reshape(b, 2 * emb)   # contiguous reshape: no HBM copy
        pred_spec = pl.BlockSpec((tile_b, 2 * emb), lambda i: (i, 0))
    else:
        pred_in = pred
        pred_spec = pl.BlockSpec((tile_b, 2, emb), lambda i: (i, 0, 0))

    kernel = functools.partial(
        _pit_loss_kernel,
        batch=b,
        tile_b=tile_b,
        emb=emb,
        flat_pred=flat_pred,
    )

    cost = pl.CostEstimate(
        flops=12 * b * emb,
        transcendentals=0,
        bytes_accessed=4 * b * emb * itemsize + n_tiles * 8 * 128 * 4,
    )

    partials = pl.pallas_call(
        kernel,
        out_shape=jax.ShapeDtypeStruct((n_tiles * 8, 128), jnp.float32),
        grid=(n_tiles,),
        in_specs=[
            pl.BlockSpec((tile_b, emb), lambda i: (i, 0)),
            pl.BlockSpec((tile_b, emb), lambda i: (i, 0)),
            pred_spec,
        ],
        out_specs=pl.BlockSpec((8, 128), lambda i: (i, 0)),
        compiler_params=pltpu.CompilerParams(
            dimension_semantics=("parallel",),
            vmem_limit_bytes=vmem_limit,
        ),
        cost_estimate=cost,
    )(y1, y2, pred_in)

    total = jnp.sum(partials)                 # tiny cross-tile finish
    if reduction == "mean":
        total = total / jnp.float32(b)
    return jnp.reshape(total, (1,))


def _ref_pit_loss(y1, y2, pred, reduction="mean"):
    y1 = y1.astype(jnp.float32)
    y2 = y2.astype(jnp.float32)
    pred = pred.astype(jnp.float32)
    d00 = jnp.mean((pred[:, 0] - y1) ** 2, axis=-1)
    d11 = jnp.mean((pred[:, 1] - y2) ** 2, axis=-1)
    d01 = jnp.mean((pred[:, 0] - y2) ** 2, axis=-1)
    d10 = jnp.mean((pred[:, 1] - y1) ** 2, axis=-1)
    total = jnp.sum(jnp.minimum(d00 + d11, d01 + d10))
    if reduction == "mean":
        total = total / y1.shape[0]
    return total


if __name__ == "__main__":
    key = jax.random.PRNGKey(0)
    k1, k2, k3, k4, k5, k6 = jax.random.split(key, 6)

    # --- small case (module-scale shapes): B=2, E=32, single tile, fallback
    # pred layout (emb % 128 != 0) -------------------------------------------
    B, EMB = 2, 32
    y1 = jax.random.normal(k1, (B, EMB), dtype=jnp.float32)
    y2 = jax.random.normal(k2, (B, EMB), dtype=jnp.float32)
    pred = jax.random.normal(k3, (B, 2, EMB), dtype=jnp.float32)

    loss = jax.block_until_ready(pit_loss(y1, y2, pred, reduction="mean"))
    ref = _ref_pit_loss(y1, y2, pred, reduction="mean")
    assert loss.shape == (1,)
    assert jnp.allclose(loss[0], ref, atol=1e-5, rtol=1e-5), (loss, ref)

    # --- gridded case: exercises parallel partial sums + ragged-tile masking
    # + flattened lane-aligned pred path (emb % 128 == 0) ---------------------
    B2, EMB2 = 100, 128  # 100 = 6*16 + 4 -> last tile is ragged
    y1b = jax.random.normal(k4, (B2, EMB2), dtype=jnp.float32)
    y2b = jax.random.normal(k5, (B2, EMB2), dtype=jnp.float32)
    predb = jax.random.normal(k6, (B2, 2, EMB2), dtype=jnp.float32)

    loss2 = jax.block_until_ready(pit_loss(y1b, y2b, predb, reduction="mean", tile_b=16))
    ref2 = _ref_pit_loss(y1b, y2b, predb, reduction="mean")
    assert jnp.allclose(loss2[0], ref2, atol=1e-5, rtol=1e-5), (loss2, ref2)

    # 'sum' reduction path
    loss3 = jax.block_until_ready(pit_loss(y1b, y2b, predb, reduction="sum", tile_b=16))
    ref3 = _ref_pit_loss(y1b, y2b, predb, reduction="sum")
    assert jnp.allclose(loss3[0], ref3, atol=1e-4, rtol=1e-5), (loss3, ref3)

    # bf16 inputs (narrow HBM stream, f32 accumulation inside the kernel)
    y1c = y1b.astype(jnp.bfloat16)
    y2c = y2b.astype(jnp.bfloat16)
    predc = predb.astype(jnp.bfloat16)
    loss4 = jax.block_until_ready(pit_loss(y1c, y2c, predc, reduction="mean", tile_b=16))
    ref4 = _ref_pit_loss(y1c, y2c, predc, reduction="mean")
    assert jnp.allclose(loss4[0], ref4, atol=2e-3, rtol=2e-3), (loss4, ref4)

    # auto tile-size path on the larger case (single big tile expected)
    loss5 = jax.block_until_ready(pit_loss(y1b, y2b, predb, reduction="mean"))
    assert jnp.allclose(loss5[0], ref2, atol=1e-5, rtol=1e-5), (loss5, ref2)

    print("KERNEL_OK")
</pallas_src>

<mosaic_0001>
module attributes {stable_mosaic.version = 11 : i64} {
  func.func @_pit_loss_kernel(%arg0: i32, %arg1: memref<2x32xf32, #tpu.memory_space<vmem>>, %arg2: memref<2x32xf32, #tpu.memory_space<vmem>>, %arg3: memref<2x2x32xf32, #tpu.memory_space<vmem>>, %arg4: memref<8x128xf32, #tpu.memory_space<vmem>>) attributes {dimension_semantics = [#tpu.dimension_semantics<parallel>], iteration_bounds = array<i64: 1>, scalar_prefetch = 0 : i64, scratch_operands = 0 : i64, tpu.core_type = #tpu.core_type<tc>, window_params = [{transform_indices = @transform_0, window_bounds = array<i64: 2, 32>}, {transform_indices = @transform_1, window_bounds = array<i64: 2, 32>}, {transform_indices = @transform_2, window_bounds = array<i64: 2, 2, 32>}, {transform_indices = @transform_3, window_bounds = array<i64: 8, 128>}]} {
    %c0 = arith.constant 0 : index
    %c0_0 = arith.constant 0 : index
    %0 = vector.load %arg1[%c0, %c0_0] : memref<2x32xf32, #tpu.memory_space<vmem>>, vector<2x32xf32>
    %c0_1 = arith.constant 0 : index
    %c0_2 = arith.constant 0 : index
    %1 = vector.load %arg2[%c0_1, %c0_2] : memref<2x32xf32, #tpu.memory_space<vmem>>, vector<2x32xf32>
    %c0_3 = arith.constant 0 : index
    %c0_4 = arith.constant 0 : index
    %c0_5 = arith.constant 0 : index
    %2 = vector.load %arg3[%c0_3, %c0_4, %c0_5] : memref<2x2x32xf32, #tpu.memory_space<vmem>>, vector<2x2x32xf32>
    %3 = vector.extract_strided_slice %2 {offsets = [0, 0, 0], sizes = [2, 1, 32], strides = [1, 1, 1]} : vector<2x2x32xf32> to vector<2x1x32xf32>
    %4 = vector.shape_cast %3 : vector<2x1x32xf32> to vector<2x32xf32>
    %5 = vector.extract_strided_slice %2 {offsets = [0, 1, 0], sizes = [2, 1, 32], strides = [1, 1, 1]} : vector<2x2x32xf32> to vector<2x1x32xf32>
    %6 = vector.shape_cast %5 : vector<2x1x32xf32> to vector<2x32xf32>
    %7 = arith.subf %4, %0 : vector<2x32xf32>
    %8 = arith.subf %6, %1 : vector<2x32xf32>
    %9 = arith.subf %4, %1 : vector<2x32xf32>
    %10 = arith.subf %6, %0 : vector<2x32xf32>
    %11 = arith.mulf %7, %7 : vector<2x32xf32>
    %12 = arith.mulf %8, %8 : vector<2x32xf32>
    %13 = arith.addf %11, %12 : vector<2x32xf32>
    %14 = arith.mulf %9, %9 : vector<2x32xf32>
    %15 = arith.mulf %10, %10 : vector<2x32xf32>
    %16 = arith.addf %14, %15 : vector<2x32xf32>
    %cst = arith.constant dense<0.000000e+00> : vector<2xf32>
    %17 = vector.multi_reduction <add>, %13, %cst [1] : vector<2x32xf32> to vector<2xf32>
    %18 = vector.shape_cast %17 : vector<2xf32> to vector<2x1xf32>
    %cst_6 = arith.constant 3.125000e-02 : f32
    %19 = vector.broadcast %cst_6 : f32 to vector<2x1xf32>
    %20 = arith.mulf %18, %19 : vector<2x1xf32>
    %cst_7 = arith.constant dense<0.000000e+00> : vector<2xf32>
    %21 = vector.multi_reduction <add>, %16, %cst_7 [1] : vector<2x32xf32> to vector<2xf32>
    %22 = vector.shape_cast %21 : vector<2xf32> to vector<2x1xf32>
    %cst_8 = arith.constant 3.125000e-02 : f32
    %23 = vector.broadcast %cst_8 : f32 to vector<2x1xf32>
    %24 = arith.mulf %22, %23 : vector<2x1xf32>
    %25 = arith.minimumf %20, %24 : vector<2x1xf32>
    %26 = tpu.iota {dimensions = array<i32: 0>} : vector<2x1xi32>
    %c2_i32 = arith.constant 2 : i32
    %27 = arith.muli %arg0, %c2_i32 : i32
    %28 = vector.broadcast %27 : i32 to vector<2x1xi32>
    %29 = arith.addi %26, %28 : vector<2x1xi32>
    %c2_i32_9 = arith.constant 2 : i32
    %30 = vector.broadcast %c2_i32_9 : i32 to vector<2x1xi32>
    %31 = arith.cmpi slt, %29, %30 : vector<2x1xi32>
    %cst_10 = arith.constant 0.000000e+00 : f32
    %32 = vector.broadcast %cst_10 : f32 to vector<2x1xf32>
    %33 = arith.select %31, %25, %32 : vector<2x1xi1>, vector<2x1xf32>
    %34 = vector.shape_cast %33 : vector<2x1xf32> to vector<1x2x1xf32>
    %cst_11 = arith.constant dense<0.000000e+00> : vector<1xf32>
    %35 = vector.multi_reduction <add>, %34, %cst_11 [1, 2] : vector<1x2x1xf32> to vector<1xf32>
    %36 = vector.shape_cast %35 : vector<1xf32> to vector<1x1x1xf32>
    %37 = vector.extract %36[0, 0, 0] : f32 from vector<1x1x1xf32>
    %38 = tpu.iota {dimensions = array<i32: 0>} : vector<8x128xi32>
    %39 = tpu.iota {dimensions = array<i32: 1>} : vector<8x128xi32>
    %c0_i32 = arith.constant 0 : i32
    %40 = vector.broadcast %c0_i32 : i32 to vector<8x128xi32>
    %41 = arith.cmpi eq, %38, %40 : vector<8x128xi32>
    %c0_i32_12 = arith.constant 0 : i32
    %42 = vector.broadcast %c0_i32_12 : i32 to vector<8x128xi32>
    %43 = arith.cmpi eq, %39, %42 : vector<8x128xi32>
    %44 = arith.andi %41, %43 : vector<8x128xi1>
    %cst_13 = arith.constant 0.000000e+00 : f32
    %45 = vector.broadcast %37 : f32 to vector<8x128xf32>
    %46 = vector.broadcast %cst_13 : f32 to vector<8x128xf32>
    %47 = arith.select %44, %45, %46 : vector<8x128xi1>, vector<8x128xf32>
    %c0_14 = arith.constant 0 : index
    %c0_15 = arith.constant 0 : index
    %48 = vector.load %arg4[%c0_14, %c0_15] : memref<8x128xf32, #tpu.memory_space<vmem>>, vector<8x128xf32>
    tpu.vector_store %arg4[%c0_14, %c0_15], %47 {strides = array<i32>} : memref<8x128xf32, #tpu.memory_space<vmem>>, vector<8x128xf32>,
    return
  }
  func.func @transform_0(%arg0: i32) -> (i32, i32) {
    %c0_i32 = arith.constant 0 : i32
    %c0_i32_0 = arith.constant 0 : i32
    return %arg0, %c0_i32 : i32, i32
  }
  func.func @transform_1(%arg0: i32) -> (i32, i32) {
    %c0_i32 = arith.constant 0 : i32
    %c0_i32_0 = arith.constant 0 : i32
    return %arg0, %c0_i32 : i32, i32
  }
  func.func @transform_2(%arg0: i32) -> (i32, i32, i32) {
    %c0_i32 = arith.constant 0 : i32
    %c0_i32_0 = arith.constant 0 : i32
    %c0_i32_1 = arith.constant 0 : i32
    return %arg0, %c0_i32, %c0_i32_0 : i32, i32, i32
  }
  func.func @transform_3(%arg0: i32) -> (i32, i32) {
    %c0_i32 = arith.constant 0 : i32
    %c0_i32_0 = arith.constant 0 : i32
    return %arg0, %c0_i32 : i32, i32
  }
}

</mosaic_0001>

<bundles_post_ra>
// kernel: tpu_custom_call.1
= control target key start
LH: loop header
LB: loop body
LE: loop exit
PB: predicated region body
PF: predicated region fallthrough
CT: control target
= control target key end

     0   :  { %8 = vsyncpa [#allocation3], 0  ;;  %s319_s0 = inlined_call_operand.hbm [shape: f32[2,32], index: 0, kind: input, shape index: {}]   ;;  %s320_s1 = inlined_call_operand.hbm [shape: f32[2,32], index: 1, kind: input, shape index: {}]   ;;  %s321_s2 = inlined_call_operand.hbm [shape: f32[2,2,32], index: 2, kind: input, shape index: {}]   ;;  %s322_s3 = inlined_call_operand.hbm [shape: f32[8,128], index: 3, kind: output, shape index: {}]  }
   0x1   :  { %9 = vsyncpa [#allocation6], 0  ;;  %s27_s14 = sshll.u32 %s320_s1, 4  ;;  %s28_s14 = int_to_ptr.hbm [resolvable:$true] %s27_s14 }
   0x2   :  { %10 = vsyncpa [#allocation4], 0  ;;  %s281_s15 = smov [#allocation5]   ;;  %s16_s19 = sshll.u32 %s319_s0, 4  ;;  %s17_s19 = int_to_ptr.hbm [resolvable:$true] %s16_s19 }
   0x3   :  { %s29_s16 = sshll.u32 %s281_s15, 4  ;;  %s282_s20 = smov [#allocation2]   ;;  %s30_s16 = int_to_ptr.vmem [resolvable:$true] %s29_s16 }
   0x4   :  { %32 = dma.hbm_to_vmem [thread:$0]  %s28_s14, 32, %s30_s16, [#allocation6]  }
   0x5   :  { %s18_s21 = sshll.u32 %s282_s20, 4  ;;  %s37_s24 = sshll.u32 %s321_s2, 4  ;;  %s19_s21 = int_to_ptr.vmem [resolvable:$true] %s18_s21  ;;  %s38_s24 = int_to_ptr.hbm [resolvable:$true] %s37_s24 }
   0x6   :  { %21 = dma.hbm_to_vmem [thread:$0]  %s17_s19, 32, %s19_s21, [#allocation3]  }
   0x7   :  { %s283_s1 = smov [#allocation7]   ;;  %s284_s26 = smov 32  }
   0x8   :  { %s39_s25 = sshll.u32 %s283_s1, 4  ;;  %s285_s27 = smov 2   ;;  %s40_s25 = int_to_ptr.vmem [resolvable:$true] %s39_s25 }
   0x9   :  { %45 = dma.hbm_to_vmem [thread:$0]  %s38_s24, 64, %s40_s25, [#allocation6], %s284_s26, %s284_s26, %s285_s27  }
   0xa   :  { %275 = dma.done.wait [#allocation3], 32  }
   0xb   :  { %276 = vsyncadd [#allocation3], 4294967264 }
   0xc   :  { %277 = dma.done.wait [#allocation6], 96  }
   0xd   :  { %278 = vsyncadd [#allocation6], 4294967200  ;;  %v58_v0 = vld [vmem:[#allocation2] sm:$0x3]  ;;  %v59_v1 = vld [vmem:[#allocation5] sm:$0x3]  ;;  %v127_v39 = vlaneseq }
   0xe   :  { %v60_v2 = vld [vmem:[#allocation7] sm:$0x3]  ;;  %v61_v3 = vld [vmem:[#allocation7 + $0x2] sm:$0x3]  ;;  %v63_v4 = vrot.slane %v58_v0, 1  ;;  %v69_v6 = vrot.slane %v59_v1, 7 }
   0xf   :  { %v66_v5 = vsub.f32 %v60_v2, %v58_v0  ;;  %v74_v7 = vrot.slane %v59_v1, 1  ;;  %v73_v8 = vsub.f32 %v61_v3, %v59_v1  ;;  %v78_v9 = vrot.slane %v58_v0, 7  ;;  %s286_s0 = smov [#allocation8]   ;;  %s160_s30 = sshll.u32 %s322_s3, 4  ;;  %s161_s30 = int_to_ptr.hbm [resolvable:$true] %s160_s30 }
  0x10   :  { %v81_v10 = vsub.f32 %v61_v3, %v58_v0  ;;  %v67_v11 = vsub.f32 %v61_v3, %v63_v4  ;;  %v72_v12 = vsub.f32 %v60_v2, %v69_v6  ;;  %v76_v15 = vsub.f32 %v60_v2, %v59_v1  ;;  %s158_s2 = sshll.u32 %s286_s0, 4  ;;  %s159_s2 = int_to_ptr.vmem [resolvable:$true] %s158_s2 }
  0x11   :  { %v77_v13 = vsub.f32 %v61_v3, %v74_v7  ;;  %v85_v14 = vmul.f32 %v73_v8, %v73_v8  ;;  %v80_v16 = vsub.f32 %v60_v2, %v78_v9  ;;  %v82_v18 = vmul.f32 %v66_v5, %v66_v5 }
  0x12   :  { %v97_v17 = vmul.f32 %v81_v10, %v81_v10  ;;  %v83_v19 = vmul.f32 %v67_v11, %v67_v11  ;;  %v84_v20 = vmul.f32 %v72_v12, %v72_v12  ;;  %v94_v27 = vmul.f32 %v76_v15, %v76_v15 }
  0x13   :  { %v95_v21 = vmul.f32 %v77_v13, %v77_v13  ;;  %v89_v22 = vrot.slane %v85_v14, 1  ;;  %v96_v23 = vmul.f32 %v80_v16, %v80_v16  ;;  %vm109_vm0 = vcmask 1041409  }
  0x14   :  { %v101_v24 = vrot.slane %v97_v17, 1  ;;  %v88_v25 = vrot.slane %v84_v20, 1  ;;  %vm112_vm1 = vcmask 254976   ;;  %v128_v40 = vshrl.u32 %v127_v39, 7 }
  0x15   :  { %v93_v26 = vadd.f32 %v89_v22, %v83_v19  ;;  %v100_v28 = vrot.slane %v96_v23, 1  ;;  %vm134_vm3 = vcmask 1024   ;;  %v146_v54 = vand.u32 127, %v127_v39 }
  0x16   :  { %v105_v29 = vadd.f32 %v101_v24, %v95_v21  ;;  %v92_v30 = vadd.f32 %v88_v25, %v82_v18  ;;  %vm132_vm2 = vcmp.lt.s32.totalorder %v128_v40, 2  ;;  %vm147_vm4 = vcmp.eq.s32.totalorder %v128_v40, 0 }
  0x17   :  { %v108_v31 = vrot.slane %v93_v26, 7  ;;  %v104_v33 = vadd.f32 %v100_v28, %v94_v27  ;;  %vm148_vm5 = vcmp.eq.s32.totalorder %v146_v54, 0 }
  0x18   :  { %v119_v34 = vrot.slane %v105_v29, 7  ;;  %vm149_vm6 = vmand %vm147_vm4, %vm148_vm5 }
  0x19   :  { %v110_v32 = vsel %vm109_vm0, %v108_v31, %v92_v30 }
  0x1a   :  { %v113_v35 = vsel %vm112_vm1, %v110_v32, 0.0  ;;  %v120_v36 = vsel %vm109_vm0, %v119_v34, %v104_v33 }
  0x1b   :  { %114 = vadd.xlane.f32.xlu0 %v113_v35  ;;  %v122_v37 = vsel %vm112_vm1, %v120_v36, 0.0 }
  0x23   :  { %123 = vadd.xlane.f32.xlu0 %v122_v37 }
  0x8e   :  { %v115_v38 = vpop.xlane.xlu0 %114 }
  0x8f   :  { %v116_v42 = vmul.f32 0.03125, %v115_v38 }
  0x96   :  { %v124_v41 = vpop.xlane.xlu0 %123 }
  0x97   :  { %v125_v43 = vmul.f32 0.03125, %v124_v41 }
  0x99   :  { %v126_v44 = vmin.f32 %v116_v42, %v125_v43 }
  0x9b   :  { %v133_v45 = vsel %vm132_vm2, %v126_v44, 0.0 }
  0x9c   :  { %v135_v46 = vsel %vm134_vm3, %v133_v45, 0.0 }
  0x9d   :  { %136 = vadd.xlane.f32.xlu1 %v135_v46 }
 0x110   :  { %v137_v47 = vpop.xlane.xlu1 %136 }
 0x111   :  { %v138_v48 = vrot.slane %v137_v47, 4 }
 0x113   :  { %v139_v49 = vadd.f32 %v138_v48, %v137_v47 }
 0x115   :  { %v140_v50 = vrot.slane %v139_v49, 2 }
 0x117   :  { %v141_v51 = vadd.f32 %v140_v50, %v139_v49 }
 0x119   :  { %v142_v52 = vrot.slane %v141_v51, 1 }
 0x11b   :  { %v143_v53 = vadd.f32 %v142_v52, %v141_v51 }
 0x11d   :  { %171 = vpush %v143_v53 }
 0x14e   :  { %s172_s4 = spop %171 }
 0x14f   :  { %v150_v55 = vstv %s172_s4 }
 0x150   :  { %v151_v56 = vsel %vm149_vm6, %v150_v55, 0.0 }
 0x151   :  { %152 = vst [vmem:[#allocation8] sm:$0xff] %v151_v56 }
 0x152   :  { %163 = dma.vmem_to_hbm [thread:$0]  %s159_s2, 128, %s161_s30, [#allocation4]  }
 0x153   :  { %279 = dma.done.wait [#allocation4], 128  }
 0x154   :  { %280 = vsyncadd [#allocation4], 4294967168 }
 0x155   :  { %168 = vsyncpa [#allocation3], 1 }
 0x156   :  { %169 = vsyncpa [#allocation6], 1 }
 0x157   :  { %170 = vsyncpa [#allocation4], 1 }

</bundles_post_ra>
